<compile_context>
chip_gen: v5e
topology: v5e:2x2
jax: 0.10.0
libtpu: 0.0.40
codegen_flags: <defaults>
</compile_context>

<pallas_src>
import jax
import jax.numpy as jnp
from jax.experimental import pallas as pl
from jax.experimental.pallas import tpu as pltpu


# ----------------------------------------------------------------------------
# Pallas kernel: lane-dense, row-tiled blend  out = a0*emb1 + a1*emb2
# ----------------------------------------------------------------------------
def _blend_kernel(attn_ref, emb1_ref, emb2_ref, out_ref):
    # attn_ref lives in SMEM: two f32 scalars (softmaxed attention weights).
    a0 = attn_ref[0]
    a1 = attn_ref[1]
    out_ref[...] = a0 * emb1_ref[...] + a1 * emb2_ref[...]


# Keep total pipelined VMEM (3 live blocks x 2 buffers) under ~12 MiB so the
# kernel fits the default scoped-VMEM limit on every chip (v5e default: 16 MiB).
_VMEM_BUDGET_BYTES = 12 * 1024 * 1024


def _blend(attn, emb1_2d, emb2_2d, *, row_tile=None):
    """Row-tiled elementwise blend over a lane-dense (rows, lane) slab."""
    rows, lane = emb1_2d.shape

    if row_tile is None:
        # 3 blocks (emb1, emb2, out) x 2 pipeline buffers x 4 B/elem.
        row_tile = _VMEM_BUDGET_BYTES // (3 * 2 * 4 * lane)
        row_tile = max(8, row_tile - (row_tile % 8))

    tr = rows if rows <= row_tile else row_tile      # full dim OR multiple of 8
    grid = (pl.cdiv(rows, tr),)

    tile = pl.BlockSpec((tr, lane), lambda i: (i, 0))

    return pl.pallas_call(
        _blend_kernel,
        grid=grid,
        in_specs=[
            pl.BlockSpec(memory_space=pltpu.MemorySpace.SMEM),  # attn (2,) scalars
            tile,                                               # emb1 tile
            tile,                                               # emb2 tile
        ],
        out_specs=tile,
        out_shape=jax.ShapeDtypeStruct((rows, lane), jnp.float32),
        compiler_params=pltpu.CompilerParams(
            dimension_semantics=("parallel",),
        ),
    )(attn, emb1_2d, emb2_2d)


def _pick_lane(total, d):
    """Largest lane width (multiple of 128) that evenly tiles the flat slab."""
    for w in (2048, 1024, 512, 256, 128):
        if total % w == 0:
            return w
    return d  # fallback: keep the original (N_all, D) layout


# ----------------------------------------------------------------------------
# Wrapper: tiny score/softmax in JAX + scatter (glue) + Pallas blend
# ----------------------------------------------------------------------------
def semantic_attention(node, edge, nodes_idx, hyperedges_idx, weight,
                       num_all_genes, *, row_tile=None):
    d = weight.shape[0]
    node = node.astype(jnp.float32)
    edge = edge.astype(jnp.float32)
    weight = weight.astype(jnp.float32)

    # Column means of the scattered tables: all untouched rows are zero and the
    # scatter indices are unique, so mean(emb, 0) == sum(small_input, 0)/N_all.
    inv_n = 1.0 / float(num_all_genes)
    repr_go = jnp.sum(node, axis=0) * inv_n            # (D,)
    repr_gene = jnp.sum(edge, axis=0) * inv_n          # (D,)
    scores = jnp.stack(
        [jnp.dot(weight, repr_go), jnp.dot(weight, repr_gene)])   # (2,)
    attn = jax.nn.softmax(scores).astype(jnp.float32)             # (2,)

    # Row scatter (glue — data-dependent indices).
    # TODO(synk): fuse the scatter into the blend output (scalar-prefetched
    # index tables + pl.Element row blocks) to avoid materializing emb1/emb2.
    emb1 = jnp.zeros((num_all_genes, d), jnp.float32).at[nodes_idx].set(node)
    emb2 = jnp.zeros((num_all_genes, d), jnp.float32).at[hyperedges_idx].set(edge)

    # Lane-dense layout for the purely elementwise blend: flatten to a slab
    # whose last dim is a multiple of 128 (falls back to (N_all, D) otherwise).
    total = num_all_genes * d
    lane = _pick_lane(total, d)
    rows = total // lane

    out = _blend(attn,
                 emb1.reshape(rows, lane),
                 emb2.reshape(rows, lane),
                 row_tile=row_tile)
    return out.reshape(num_all_genes, d), scores


# ----------------------------------------------------------------------------
# Pure-JAX reference mirroring the PyTorch forward exactly
# ----------------------------------------------------------------------------
def semantic_attention_ref(node, edge, nodes_idx, hyperedges_idx, weight,
                           num_all_genes):
    d = weight.shape[0]
    emb1 = jnp.zeros((num_all_genes, d), jnp.float32).at[nodes_idx].set(node)
    emb2 = jnp.zeros((num_all_genes, d), jnp.float32).at[hyperedges_idx].set(edge)
    repr_go = jnp.mean(emb1, axis=0)
    repr_gene = jnp.mean(emb2, axis=0)
    repr_ = jnp.stack([repr_go, repr_gene], axis=1)               # (D, 2)
    scores = weight @ repr_                                       # (2,)
    attn = jax.nn.softmax(scores, axis=-1)
    out = attn[0] * emb1 + attn[1] * emb2
    return out, scores


def _run_case(key, num_all_genes, input_dim, n_nodes, n_hyperedges,
              row_tile=None):
    k_node, k_edge, k_w, k_idx1, k_idx2 = jax.random.split(key, 5)
    node = jax.random.normal(k_node, (n_nodes, input_dim), jnp.float32)
    edge = jax.random.normal(k_edge, (n_hyperedges, input_dim), jnp.float32)
    weight = 0.01 * jax.random.normal(k_w, (input_dim,), jnp.float32)
    nodes_idx = jax.random.choice(k_idx1, num_all_genes, (n_nodes,),
                                  replace=False)
    hyperedges_idx = jax.random.choice(k_idx2, num_all_genes, (n_hyperedges,),
                                       replace=False)

    out, scores = semantic_attention(
        node, edge, nodes_idx, hyperedges_idx, weight, num_all_genes,
        row_tile=row_tile)
    out = jax.block_until_ready(out)
    scores = jax.block_until_ready(scores)

    out_ref, scores_ref = semantic_attention_ref(
        node, edge, nodes_idx, hyperedges_idx, weight, num_all_genes)

    assert out.shape == (num_all_genes, input_dim)
    assert scores.shape == (2,)
    assert jnp.allclose(out, out_ref, atol=1e-5, rtol=1e-5), "out mismatch"
    assert jnp.allclose(scores, scores_ref, atol=1e-6, rtol=1e-5), "scores mismatch"


if __name__ == "__main__":
    key = jax.random.PRNGKey(0)
    k1, k2 = jax.random.split(key)

    # Case 1: small toy shape (single-block path): 24 genes, D=32.
    _run_case(k1, num_all_genes=24, input_dim=32, n_nodes=10, n_hyperedges=6)

    # Case 2: multi-step grid with a ragged final row block (forced small tile).
    _run_case(k2, num_all_genes=300, input_dim=64, n_nodes=32, n_hyperedges=12,
              row_tile=16)

    print("KERNEL_OK")
</pallas_src>

<mosaic_0001>
module attributes {stable_mosaic.version = 11 : i64} {
  func.func @_blend_kernel(%arg0: i32, %arg1: memref<2xf32, #tpu.memory_space<smem>>, %arg2: memref<3x256xf32, #tpu.memory_space<vmem>>, %arg3: memref<3x256xf32, #tpu.memory_space<vmem>>, %arg4: memref<3x256xf32, #tpu.memory_space<vmem>>) attributes {dimension_semantics = [#tpu.dimension_semantics<parallel>], iteration_bounds = array<i64: 1>, scalar_prefetch = 0 : i64, scratch_operands = 0 : i64, tpu.core_type = #tpu.core_type<tc>, window_params = [{transform_indices = @transform_0, window_bounds = array<i64: 2>}, {transform_indices = @transform_1, window_bounds = array<i64: 3, 256>}, {transform_indices = @transform_2, window_bounds = array<i64: 3, 256>}, {transform_indices = @transform_3, window_bounds = array<i64: 3, 256>}]} {
    %c0 = arith.constant 0 : index
    %0 = memref.load %arg1[%c0] : memref<2xf32, #tpu.memory_space<smem>>
    %c1 = arith.constant 1 : index
    %1 = memref.load %arg1[%c1] : memref<2xf32, #tpu.memory_space<smem>>
    %c0_0 = arith.constant 0 : index
    %c0_1 = arith.constant 0 : index
    %2 = vector.load %arg2[%c0_0, %c0_1] : memref<3x256xf32, #tpu.memory_space<vmem>>, vector<3x256xf32>
    %3 = vector.broadcast %0 : f32 to vector<3x256xf32>
    %4 = arith.mulf %3, %2 : vector<3x256xf32>
    %c0_2 = arith.constant 0 : index
    %c0_3 = arith.constant 0 : index
    %5 = vector.load %arg3[%c0_2, %c0_3] : memref<3x256xf32, #tpu.memory_space<vmem>>, vector<3x256xf32>
    %6 = vector.broadcast %1 : f32 to vector<3x256xf32>
    %7 = arith.mulf %6, %5 : vector<3x256xf32>
    %8 = arith.addf %4, %7 : vector<3x256xf32>
    %c0_4 = arith.constant 0 : index
    %c0_5 = arith.constant 0 : index
    %9 = vector.load %arg4[%c0_4, %c0_5] : memref<3x256xf32, #tpu.memory_space<vmem>>, vector<3x256xf32>
    tpu.vector_store %arg4[%c0_4, %c0_5], %8 {strides = array<i32>} : memref<3x256xf32, #tpu.memory_space<vmem>>, vector<3x256xf32>,
    return
  }
  func.func @transform_0(%arg0: i32) -> i32 {
    %c0_i32 = arith.constant 0 : i32
    %c0_i32_0 = arith.constant 0 : i32
    return %c0_i32 : i32
  }
  func.func @transform_1(%arg0: i32) -> (i32, i32) {
    %c0_i32 = arith.constant 0 : i32
    %c0_i32_0 = arith.constant 0 : i32
    return %arg0, %c0_i32 : i32, i32
  }
  func.func @transform_2(%arg0: i32) -> (i32, i32) {
    %c0_i32 = arith.constant 0 : i32
    %c0_i32_0 = arith.constant 0 : i32
    return %arg0, %c0_i32 : i32, i32
  }
  func.func @transform_3(%arg0: i32) -> (i32, i32) {
    %c0_i32 = arith.constant 0 : i32
    %c0_i32_0 = arith.constant 0 : i32
    return %arg0, %c0_i32 : i32, i32
  }
}

</mosaic_0001>

<bundles_post_ra>
// kernel: tpu_custom_call.1
= control target key start
LH: loop header
LB: loop body
LE: loop exit
PB: predicated region body
PF: predicated region fallthrough
CT: control target
= control target key end

     0   :  { %8 = vsyncpa [#allocation5], 0  ;;  %s218_s0 = inlined_call_operand.hbm [shape: f32[2], index: 0, kind: input, shape index: {}]   ;;  %s219_s1 = inlined_call_operand.hbm [shape: f32[3,256], index: 1, kind: input, shape index: {}]   ;;  %s220_s2 = inlined_call_operand.hbm [shape: f32[3,256], index: 2, kind: input, shape index: {}]   ;;  %s221_s3 = inlined_call_operand.hbm [shape: f32[3,256], index: 3, kind: output, shape index: {}]  }
   0x1   :  { %9 = vsyncpa [#allocation3], 0 }
   0x2   :  { %10 = vsyncpa [#allocation8], 0 }
   0x3   :  { %11 = vsyncpa [#allocation4], 0  ;;  %s17_s14 = sshll.u32 %s218_s0, 4  ;;  %s26_s17 = sshll.u32 %s219_s1, 4  ;;  %s18_s14 = int_to_ptr.hbm [resolvable:$true] %s17_s14  ;;  %s27_s17 = int_to_ptr.hbm [resolvable:$true] %s26_s17 }
   0x4   :  { %s182_s18 = smov [#allocation2]   ;;  %s183_s19 = smov [#allocation6]  }
   0x5   :  { %20 = dma.hbm_to_smem %s18_s14, 16, %s182_s18, [#allocation5]  }
   0x6   :  { %s28_s20 = sshll.u32 %s183_s19, 4  ;;  %s37_s23 = sshll.u32 %s220_s2, 4  ;;  %s29_s20 = int_to_ptr.vmem [resolvable:$true] %s28_s20  ;;  %s38_s23 = int_to_ptr.hbm [resolvable:$true] %s37_s23 }
   0x7   :  { %31 = dma.hbm_to_vmem [thread:$0]  %s27_s17, 128, %s29_s20, [#allocation3]  }
   0x8   :  { %s184_s24 = smov [#allocation7]  }
   0x9   :  { %s39_s25 = sshll.u32 %s184_s24, 4  ;;  %s40_s25 = int_to_ptr.vmem [resolvable:$true] %s39_s25 }
   0xa   :  { %42 = dma.hbm_to_vmem [thread:$0]  %s38_s23, 128, %s40_s25, [#allocation8]  }
   0xb   :  { %174 = dma.done.wait [#allocation5], 16  }
   0xc   :  { %175 = vsyncadd [#allocation5], 4294967280 }
   0xd   :  { %176 = dma.done.wait [#allocation3], 128  }
   0xe   :  { %177 = vsyncadd [#allocation3], 4294967168 }
   0xf   :  { %178 = dma.done.wait [#allocation8], 128  }
  0x10   :  { %179 = vsyncadd [#allocation8], 4294967168 }
  0x11   :  { %55 = sfence }
  0x12   :  { %s56_s0 = sld [smem:[#allocation2]]  ;;  %v58_v0 = vld [vmem:[#allocation6] sm:$0x77]  ;;  %v61_v1 = vld [vmem:[#allocation7] sm:$0x77]  ;;  %s185_s2 = smov [#allocation9]  }
  0x13   :  { %s85_s1 = sld [smem:[#allocation2 + $0x1]]  ;;  %s71_s26 = sshll.u32 %s185_s2, 4  ;;  %s72_s26 = int_to_ptr.vmem [resolvable:$true] %s71_s26 }
  0x14   :  { %s73_s29 = sshll.u32 %s221_s3, 4  ;;  %s74_s29 = int_to_ptr.hbm [resolvable:$true] %s73_s29 }
  0x18   :  { %v59_v2 = vstv %s56_s0 }
  0x19   :  { %v60_v3 = vmul.f32 %v59_v2, %v58_v0  ;;  %v62_v4 = vstv %s85_s1 }
  0x1a   :  { %v63_v5 = vmul.f32 %v62_v4, %v61_v1 }
  0x1c   :  { %v64_v6 = vadd.f32 %v63_v5, %v60_v3 }
  0x1e   :  { %65 = vst [vmem:[#allocation9] sm:$0x77] %v64_v6 }
  0x1f   :  { %76 = dma.vmem_to_hbm [thread:$0]  %s72_s26, 128, %s74_s29, [#allocation4]  }
  0x20   :  { %180 = dma.done.wait [#allocation4], 128  }
  0x21   :  { %181 = vsyncadd [#allocation4], 4294967168 }
  0x22   :  { %81 = vsyncpa [#allocation3], 1 }
  0x23   :  { %82 = vsyncpa [#allocation8], 1 }
  0x24   :  { %83 = vsyncpa [#allocation4], 1 }
  0x25   :  { %84 = vsyncpa [#allocation5], 1 }

</bundles_post_ra>
